<compile_context>
chip_gen: v5e
topology: v5e:2x2
jax: 0.10.0
libtpu: 0.0.40
codegen_flags: <defaults>
</compile_context>

<pallas_src>
import math

import jax
import jax.numpy as jnp
from jax.experimental import pallas as pl
from jax.experimental.pallas import tpu as pltpu

NEG_SLOPE = 0.01      # PyTorch F.leaky_relu default
LANE = 128            # TPU lane width
TB = 128              # batch tile (rows per grid step)


def _leaky_relu(x):
    return jnp.where(x > 0, x, NEG_SLOPE * x)


def _round_up(n, m):
    return ((n + m - 1) // m) * m


def qnetwork_kernel(x_ref, w1_ref, b1_ref, w2_ref, b2_ref, w3_ref, b3_ref, out_ref):
    x = x_ref[...]                                                   # [TB, S_pad] f32
    # fc_1 + leaky_relu  (bf16 MXU, f32 accumulate / bias / activation)
    h1 = jnp.dot(x.astype(jnp.bfloat16), w1_ref[...],
                 preferred_element_type=jnp.float32) + b1_ref[...]
    h1 = _leaky_relu(h1)                                             # [TB, H_pad]
    # fc_2 + leaky_relu
    h2 = jnp.dot(h1.astype(jnp.bfloat16), w2_ref[...],
                 preferred_element_type=jnp.float32) + b2_ref[...]
    h2 = _leaky_relu(h2)                                             # [TB, H_pad]
    # fc_3 (no activation)
    q = jnp.dot(h2.astype(jnp.bfloat16), w3_ref[...],
                preferred_element_type=jnp.float32) + b3_ref[...]
    out_ref[...] = q.astype(out_ref.dtype)                           # [TB, A_pad]


def qnetwork_forward(x, params, action_dim):
    """x: [batch, state_dim] float32.  params hold lane-padded bf16 weights / f32 biases."""
    w1, b1 = params["w1"], params["b1"]
    w2, b2 = params["w2"], params["b2"]
    w3, b3 = params["w3"], params["b3"]

    B, S = x.shape
    S_pad, H_pad = w1.shape
    A_pad = w3.shape[1]

    # Pad batch to a multiple of the batch tile and state to the padded lane width.
    B_pad = _round_up(max(B, 1), TB)
    x_pad = jnp.zeros((B_pad, S_pad), jnp.float32).at[:B, :S].set(x)

    grid = (B_pad // TB,)

    flops = 2 * B_pad * (S_pad * H_pad + H_pad * H_pad + H_pad * A_pad)
    bytes_accessed = (
        x_pad.size * 4
        + (w1.size + w2.size + w3.size) * 2                 # bf16 weights
        + (b1.size + b2.size + b3.size) * 4                 # f32 biases
        + B_pad * A_pad * 4                                  # f32 output
    )

    out = pl.pallas_call(
        qnetwork_kernel,
        out_shape=jax.ShapeDtypeStruct((B_pad, A_pad), jnp.float32),
        grid=grid,
        in_specs=[
            pl.BlockSpec((TB, S_pad), lambda i: (i, 0)),     # x: tiled over batch
            pl.BlockSpec(w1.shape, lambda i: (0, 0)),        # weights/biases: VMEM-resident
            pl.BlockSpec(b1.shape, lambda i: (0, 0)),
            pl.BlockSpec(w2.shape, lambda i: (0, 0)),
            pl.BlockSpec(b2.shape, lambda i: (0, 0)),
            pl.BlockSpec(w3.shape, lambda i: (0, 0)),
            pl.BlockSpec(b3.shape, lambda i: (0, 0)),
        ],
        out_specs=pl.BlockSpec((TB, A_pad), lambda i: (i, 0)),
        compiler_params=pltpu.CompilerParams(
            dimension_semantics=("parallel",)),              # v7x: shard batch over 2 TCs
        cost_estimate=pl.CostEstimate(
            flops=flops, transcendentals=0, bytes_accessed=bytes_accessed),
    )(x_pad, w1, b1, w2, b2, w3, b3)

    # Slice the real batch rows and action columns back out (lane-dense inside the kernel).
    return out[:B, :action_dim]


def init_params(key, state_dim, hidden_dim, action_dim):
    """PyTorch-Linear-style U(-1/sqrt(fan_in), +1/sqrt(fan_in)) init.

    Returns (padded bf16/f32 params for the kernel, unpadded f32 params for a
    pure-f32 reference check).  Padded weights are [in_pad, out_pad] with zeros
    in the padding rows/cols, so padded lanes stay exactly zero through the MLP.
    """
    ks = jax.random.split(key, 6)
    S_pad = _round_up(state_dim, LANE)
    H_pad = _round_up(hidden_dim, LANE)
    A_pad = _round_up(action_dim, LANE)

    def linear(kw, kb, fan_in, fan_out, in_pad, out_pad):
        bound = 1.0 / math.sqrt(fan_in)
        w = jax.random.uniform(kw, (fan_in, fan_out), jnp.float32, -bound, bound)
        b = jax.random.uniform(kb, (1, fan_out), jnp.float32, -bound, bound)
        w_pad = jnp.zeros((in_pad, out_pad), jnp.float32).at[:fan_in, :fan_out].set(w)
        b_pad = jnp.zeros((1, out_pad), jnp.float32).at[:, :fan_out].set(b)
        return w_pad.astype(jnp.bfloat16), b_pad, w, b

    w1p, b1p, w1, b1 = linear(ks[0], ks[1], state_dim, hidden_dim, S_pad, H_pad)
    w2p, b2p, w2, b2 = linear(ks[2], ks[3], hidden_dim, hidden_dim, H_pad, H_pad)
    w3p, b3p, w3, b3 = linear(ks[4], ks[5], hidden_dim, action_dim, H_pad, A_pad)

    params = {"w1": w1p, "b1": b1p, "w2": w2p, "b2": b2p, "w3": w3p, "b3": b3p}
    params_f32 = {"w1": w1, "b1": b1, "w2": w2, "b2": b2, "w3": w3, "b3": b3}
    return params, params_f32


def qnetwork_ref_bf16(x, p, action_dim):
    """Pure-JAX reference with the SAME bf16-weight / f32-accumulate math as the kernel."""
    S_pad = p["w1"].shape[0]
    x_pad = jnp.zeros((x.shape[0], S_pad), jnp.float32).at[:, : x.shape[1]].set(x)
    h1 = _leaky_relu(jnp.dot(x_pad.astype(jnp.bfloat16), p["w1"],
                             preferred_element_type=jnp.float32) + p["b1"])
    h2 = _leaky_relu(jnp.dot(h1.astype(jnp.bfloat16), p["w2"],
                             preferred_element_type=jnp.float32) + p["b2"])
    q = jnp.dot(h2.astype(jnp.bfloat16), p["w3"],
                preferred_element_type=jnp.float32) + p["b3"]
    return q[:, :action_dim]


def qnetwork_ref_f32(x, p):
    """Pure-f32 reference matching the original PyTorch module exactly."""
    h1 = _leaky_relu(x @ p["w1"] + p["b1"])
    h2 = _leaky_relu(h1 @ p["w2"] + p["b2"])
    return h2 @ p["w3"] + p["b3"]


# TODO(synk): optional fusion of argmax-over-actions (DQN action selection) into the
# kernel would remove the [B, A] writeback entirely; kept separate to preserve the
# module's forward() signature.

if __name__ == "__main__":
    batch, state_dim, hidden_dim, action_dim = 256, 16, 32, 4

    key = jax.random.PRNGKey(0)
    kx, kp = jax.random.split(key)
    x = jax.random.normal(kx, (batch, state_dim), jnp.float32)
    params, params_f32 = init_params(kp, state_dim, hidden_dim, action_dim)

    out = qnetwork_forward(x, params, action_dim)
    out = jax.block_until_ready(out)
    assert out.shape == (batch, action_dim)

    # Tight check vs. an identical bf16-weight / f32-accumulate JAX reference.
    ref_bf16 = qnetwork_ref_bf16(x, params, action_dim)
    assert jnp.allclose(out, ref_bf16, atol=1e-3, rtol=1e-3), "mismatch vs bf16 reference"

    # Loose check vs. the full-f32 PyTorch-equivalent reference (bf16 weight quantization).
    ref_f32 = qnetwork_ref_f32(x, params_f32)
    assert jnp.allclose(out, ref_f32, atol=5e-2, rtol=5e-2), "mismatch vs f32 reference"

    print("KERNEL_OK")
</pallas_src>

<mosaic_0001>
module attributes {stable_mosaic.version = 11 : i64} {
  func.func @qnetwork_kernel(%arg0: i32, %arg1: memref<128x128xf32, #tpu.memory_space<vmem>>, %arg2: memref<128x128xbf16, #tpu.memory_space<vmem>>, %arg3: memref<1x128xf32, #tpu.memory_space<vmem>>, %arg4: memref<128x128xbf16, #tpu.memory_space<vmem>>, %arg5: memref<1x128xf32, #tpu.memory_space<vmem>>, %arg6: memref<128x128xbf16, #tpu.memory_space<vmem>>, %arg7: memref<1x128xf32, #tpu.memory_space<vmem>>, %arg8: memref<128x128xf32, #tpu.memory_space<vmem>>) attributes {dimension_semantics = [#tpu.dimension_semantics<parallel>], iteration_bounds = array<i64: 2>, scalar_prefetch = 0 : i64, scratch_operands = 0 : i64, tpu.core_type = #tpu.core_type<tc>, window_params = [{transform_indices = @transform_0, window_bounds = array<i64: 128, 128>}, {pipeline_mode = #tpu.pipeline_mode<synchronous>, transform_indices = @transform_1, window_bounds = array<i64: 128, 128>}, {pipeline_mode = #tpu.pipeline_mode<synchronous>, transform_indices = @transform_2, window_bounds = array<i64: 1, 128>}, {pipeline_mode = #tpu.pipeline_mode<synchronous>, transform_indices = @transform_3, window_bounds = array<i64: 128, 128>}, {pipeline_mode = #tpu.pipeline_mode<synchronous>, transform_indices = @transform_4, window_bounds = array<i64: 1, 128>}, {pipeline_mode = #tpu.pipeline_mode<synchronous>, transform_indices = @transform_5, window_bounds = array<i64: 128, 128>}, {pipeline_mode = #tpu.pipeline_mode<synchronous>, transform_indices = @transform_6, window_bounds = array<i64: 1, 128>}, {transform_indices = @transform_7, window_bounds = array<i64: 128, 128>}]} {
    %c0 = arith.constant 0 : index
    %c0_0 = arith.constant 0 : index
    %0 = vector.load %arg1[%c0, %c0_0] : memref<128x128xf32, #tpu.memory_space<vmem>>, vector<128x128xf32>
    %1 = arith.truncf %0 : vector<128x128xf32> to vector<128x128xbf16>
    %c0_1 = arith.constant 0 : index
    %c0_2 = arith.constant 0 : index
    %2 = vector.load %arg2[%c0_1, %c0_2] : memref<128x128xbf16, #tpu.memory_space<vmem>>, vector<128x128xbf16>
    %cst = arith.constant dense<0.000000e+00> : vector<128x128xf32>
    %3 = tpu.matmul %1, %2, %cst {dimension_numbers = #tpu.dot_dimension_numbers<[1], [0], [0], [1], [0, 0, 1, 1], [], []>} : vector<128x128xbf16>, vector<128x128xbf16>, vector<128x128xf32> -> vector<128x128xf32>
    %c0_3 = arith.constant 0 : index
    %c0_4 = arith.constant 0 : index
    %4 = vector.load %arg3[%c0_3, %c0_4] : memref<1x128xf32, #tpu.memory_space<vmem>>, vector<1x128xf32>
    %5 = vector.broadcast %4 : vector<1x128xf32> to vector<128x128xf32>
    %6 = arith.addf %3, %5 : vector<128x128xf32>
    %cst_5 = arith.constant 0.000000e+00 : f32
    %7 = vector.broadcast %cst_5 : f32 to vector<128x128xf32>
    %8 = arith.cmpf ogt, %6, %7 : vector<128x128xf32>
    %cst_6 = arith.constant 0.00999999977 : f32
    %9 = vector.broadcast %cst_6 : f32 to vector<128x128xf32>
    %10 = arith.mulf %9, %6 : vector<128x128xf32>
    %11 = arith.select %8, %6, %10 : vector<128x128xi1>, vector<128x128xf32>
    %12 = arith.truncf %11 : vector<128x128xf32> to vector<128x128xbf16>
    %c0_7 = arith.constant 0 : index
    %c0_8 = arith.constant 0 : index
    %13 = vector.load %arg4[%c0_7, %c0_8] : memref<128x128xbf16, #tpu.memory_space<vmem>>, vector<128x128xbf16>
    %cst_9 = arith.constant dense<0.000000e+00> : vector<128x128xf32>
    %14 = tpu.matmul %12, %13, %cst_9 {dimension_numbers = #tpu.dot_dimension_numbers<[1], [0], [0], [1], [0, 0, 1, 1], [], []>} : vector<128x128xbf16>, vector<128x128xbf16>, vector<128x128xf32> -> vector<128x128xf32>
    %c0_10 = arith.constant 0 : index
    %c0_11 = arith.constant 0 : index
    %15 = vector.load %arg5[%c0_10, %c0_11] : memref<1x128xf32, #tpu.memory_space<vmem>>, vector<1x128xf32>
    %16 = vector.broadcast %15 : vector<1x128xf32> to vector<128x128xf32>
    %17 = arith.addf %14, %16 : vector<128x128xf32>
    %cst_12 = arith.constant 0.000000e+00 : f32
    %18 = vector.broadcast %cst_12 : f32 to vector<128x128xf32>
    %19 = arith.cmpf ogt, %17, %18 : vector<128x128xf32>
    %cst_13 = arith.constant 0.00999999977 : f32
    %20 = vector.broadcast %cst_13 : f32 to vector<128x128xf32>
    %21 = arith.mulf %20, %17 : vector<128x128xf32>
    %22 = arith.select %19, %17, %21 : vector<128x128xi1>, vector<128x128xf32>
    %23 = arith.truncf %22 : vector<128x128xf32> to vector<128x128xbf16>
    %c0_14 = arith.constant 0 : index
    %c0_15 = arith.constant 0 : index
    %24 = vector.load %arg6[%c0_14, %c0_15] : memref<128x128xbf16, #tpu.memory_space<vmem>>, vector<128x128xbf16>
    %cst_16 = arith.constant dense<0.000000e+00> : vector<128x128xf32>
    %25 = tpu.matmul %23, %24, %cst_16 {dimension_numbers = #tpu.dot_dimension_numbers<[1], [0], [0], [1], [0, 0, 1, 1], [], []>} : vector<128x128xbf16>, vector<128x128xbf16>, vector<128x128xf32> -> vector<128x128xf32>
    %c0_17 = arith.constant 0 : index
    %c0_18 = arith.constant 0 : index
    %26 = vector.load %arg7[%c0_17, %c0_18] : memref<1x128xf32, #tpu.memory_space<vmem>>, vector<1x128xf32>
    %27 = vector.broadcast %26 : vector<1x128xf32> to vector<128x128xf32>
    %28 = arith.addf %25, %27 : vector<128x128xf32>
    %c0_19 = arith.constant 0 : index
    %c0_20 = arith.constant 0 : index
    %29 = vector.load %arg8[%c0_19, %c0_20] : memref<128x128xf32, #tpu.memory_space<vmem>>, vector<128x128xf32>
    tpu.vector_store %arg8[%c0_19, %c0_20], %28 {strides = array<i32>} : memref<128x128xf32, #tpu.memory_space<vmem>>, vector<128x128xf32>,
    return
  }
  func.func @transform_0(%arg0: i32) -> (i32, i32) {
    %c0_i32 = arith.constant 0 : i32
    %c0_i32_0 = arith.constant 0 : i32
    return %arg0, %c0_i32 : i32, i32
  }
  func.func @transform_1(%arg0: i32) -> (i32, i32) {
    %c0_i32 = arith.constant 0 : i32
    %c0_i32_0 = arith.constant 0 : i32
    %c0_i32_1 = arith.constant 0 : i32
    return %c0_i32, %c0_i32_0 : i32, i32
  }
  func.func @transform_2(%arg0: i32) -> (i32, i32) {
    %c0_i32 = arith.constant 0 : i32
    %c0_i32_0 = arith.constant 0 : i32
    %c0_i32_1 = arith.constant 0 : i32
    return %c0_i32, %c0_i32_0 : i32, i32
  }
  func.func @transform_3(%arg0: i32) -> (i32, i32) {
    %c0_i32 = arith.constant 0 : i32
    %c0_i32_0 = arith.constant 0 : i32
    %c0_i32_1 = arith.constant 0 : i32
    return %c0_i32, %c0_i32_0 : i32, i32
  }
  func.func @transform_4(%arg0: i32) -> (i32, i32) {
    %c0_i32 = arith.constant 0 : i32
    %c0_i32_0 = arith.constant 0 : i32
    %c0_i32_1 = arith.constant 0 : i32
    return %c0_i32, %c0_i32_0 : i32, i32
  }
  func.func @transform_5(%arg0: i32) -> (i32, i32) {
    %c0_i32 = arith.constant 0 : i32
    %c0_i32_0 = arith.constant 0 : i32
    %c0_i32_1 = arith.constant 0 : i32
    return %c0_i32, %c0_i32_0 : i32, i32
  }
  func.func @transform_6(%arg0: i32) -> (i32, i32) {
    %c0_i32 = arith.constant 0 : i32
    %c0_i32_0 = arith.constant 0 : i32
    %c0_i32_1 = arith.constant 0 : i32
    return %c0_i32, %c0_i32_0 : i32, i32
  }
  func.func @transform_7(%arg0: i32) -> (i32, i32) {
    %c0_i32 = arith.constant 0 : i32
    %c0_i32_0 = arith.constant 0 : i32
    return %arg0, %c0_i32 : i32, i32
  }
}

</mosaic_0001>

<bundles_post_ra>
// kernel: tpu_custom_call.1
= control target key start
LH: loop header
LB: loop body
LE: loop exit
PB: predicated region body
PF: predicated region fallthrough
CT: control target
= control target key end

     0   :  { %s1715_s0 = inlined_call_operand.hbm [shape: f32[256,128], index: 0, kind: input, shape index: {}]   ;;  %s1716_s1 = inlined_call_operand.hbm [shape: bf16[128,128], index: 1, kind: input, shape index: {}]   ;;  %s1717_s2 = inlined_call_operand.vmem [shape: f32[1,128], index: 2, kind: input, shape index: {}]   ;;  %s1718_s3 = inlined_call_operand.hbm [shape: bf16[128,128], index: 3, kind: input, shape index: {}]   ;;  %s1719_s4 = inlined_call_operand.vmem [shape: f32[1,128], index: 4, kind: input, shape index: {}]   ;;  %s1720_s5 = inlined_call_operand.hbm [shape: bf16[128,128], index: 5, kind: input, shape index: {}]   ;;  %s1721_s6 = inlined_call_operand.vmem [shape: f32[1,128], index: 6, kind: input, shape index: {}]   ;;  %s1722_s7 = inlined_call_operand.hbm [shape: f32[256,128], index: 7, kind: output, shape index: {}]  }
   0x1   :  { %1723 = sst [smem:[#allocation15_spill]] %s1716_s1 }
   0x2   :  { %12 = vsyncpa [#allocation3], 0 }
   0x3   :  { %14 = vsyncpa [#allocation3 + $0x1], 0 }
   0x4   :  { %15 = vsyncpa [#allocation6], 0 }
   0x5   :  { %16 = vsyncpa [#allocation9], 0 }
   0x6   :  { %17 = vsyncpa [#allocation4], 0 }
   0x7   :  { %19 = vsyncpa [#allocation4 + $0x1], 0  ;;  %s1469_s24 = smov 0   ;;  %s1471_s25 = smov 0  }
   0x8   :  { %s1473_s26 = smov 0   ;;  %s1475_s27 = smov 0  }
   0x9 LB: > { %s1490_s28 = sadd.s32 4294967295, %s1418_s27   ;;  %s972_s29 = sadd.s32 4294967294, %s1418_s27   ;;  %s1418_s27 = sphi %s1475_s27, %s1735_s27   ;;  %s1414_s26 = sphi %s1473_s26, %s1734_s26   ;;  %s1410_s25 = sphi %s1471_s25, %s1733_s25   ;;  %s1406_s24 = sphi %s1469_s24, %s1732_s24  }
   0xa   : > { %p45_p0 = scmp.ne.s32.totalorder %s1410_s25, %s1406_s24  ;;  %p46_p1 = scmp.eq.s32.totalorder %s1490_s28, 0 }
   0xb   : > { %p195_p2 = scmp.eq.s32.totalorder %s1490_s28, 1  ;;  %p201_p3 = scmp.eq.s32.totalorder %s972_s29, 1 }
   0xc   : > { %p1499_p4 = por %p46_p1, %p45_p0  ;;  %p973_p5 = scmp.ge.s32.totalorder %s1418_s27, 1 }
   0xd   : > { %p1504_p6 = por %p201_p3, %p45_p0  ;;  %p208_p7 = scmp.lt.s32.totalorder %s1418_s27, 3 }
   0xe   : > { %s1726_s1 = sld [smem:[#allocation15_spill]]  ;;  %s1420_s13 = smov [#allocation5]  }
   0xf   : > { %p1512_p8 = pnand %p973_p5, %p208_p7  ;;  %s221_s14 = sshll.u32 %s1420_s13, 4  ;;  %s222_s14 = int_to_ptr.vmem [resolvable:$true] %s221_s14 }
  0x10   : > { %s236_s18 = sshll.u32 %s1718_s3, 4  ;;  %s1421_s19 = smov 64   ;;  %s237_s18 = int_to_ptr.hbm [resolvable:$true] %s236_s18 }
  0x11   : > { %p1154_p9 = pneg %p1512_p8  ;;  %s1422_s20 = smov 4  }
  0x12   : > { %s1423_s21 = smov [#allocation7]   ;;  %s253_s9 = sshll.u32 %s1720_s5, 4  ;;  %s254_s9 = int_to_ptr.hbm [resolvable:$true] %s253_s9 }
  0x13   : > { %p1520_p10 = pnand %p1154_p9, %p46_p1  ;;  %s238_s22 = sshll.u32 %s1423_s21, 4  ;;  %s239_s22 = int_to_ptr.vmem [resolvable:$true] %s238_s22 }
  0x14   : > { %s219_s11 = sshll.u32 %s1726_s1, 4  ;;  %s1424_s10 = smov [#allocation8]   ;;  %s220_s11 = int_to_ptr.hbm [resolvable:$true] %s219_s11 }
  0x15   : > { %1157 = dma.hbm_to_vmem [thread:$0]  (!%p1520_p10), %s220_s11, 1024, %s222_s14, [#allocation6], %s1421_s19, %s1421_s19, %s1422_s20  }
  0x16   : > { %1160 = dma.hbm_to_vmem [thread:$0]  (!%p1520_p10), %s237_s18, 1024, %s239_s22, [#allocation6], %s1421_s19, %s1421_s19, %s1422_s20  }
  0x17   : > { %s255_s13 = sshll.u32 %s1424_s10, 4  ;;  %s1536_s11 = sadd.s32 1, %s1418_s27   ;;  %s256_s13 = int_to_ptr.vmem [resolvable:$true] %s255_s13 }
  0x18   : > { %1163 = dma.hbm_to_vmem [thread:$0]  (!%p1520_p10), %s254_s9, 1024, %s256_s13, [#allocation9], %s1421_s19, %s1421_s19, %s1422_s20  }
  0x19   : > { %s29_s14 = ssub.s32 %s1418_s27, %s1536_s11  ;;  %s32_s16 = sadd.s32 1, %s1414_s26 }
  0x1a   : > { %p30_p12 = scmp.eq.s32.totalorder %s29_s14, 0  ;;  %p39_p13 = scmp.ne.s32.totalorder %s1414_s26, %s1410_s25 }
  0x1b   : > { %p40_p0 = scmp.eq.s32.totalorder %s1418_s27, 0  ;;  %p1175_p3 = scmp.lt.s32.totalorder %s1418_s27, 2 }
  0x1c   : > { %s1548_s17 = scalar_select %p30_p12, %s1414_s26, %s32_s16  }
  0x1d   : > { %p41_p5 = por %p40_p0, %p39_p13  ;;  %p1552_p7 = por %p195_p2, %p39_p13 }
  0x1e   : > { %s272_s21 = sand.u32 1, %s1414_s26   ;;  %s1088_s22 = sshll.u32 %s1418_s27, 7 }
  0x1f   : > { %s978_s15 = sshll.u32 %s272_s21, 7  ;;  %s281_s20 = scalar_lea.hbm %s1715_s0, %s1088_s22 }
  0x20   : > { %s282_s29 = sshll.u32 %s281_s20, 4  ;;  %s276_s9 = scalar_lea.vmem [#allocation2], %s978_s15  ;;  %s283_s29 = int_to_ptr.hbm [resolvable:$true] %s282_s29 }
  0x21   : > { %s284_s10 = sshll.u32 %s276_s9, 4  ;;  %p1563_p9 = pnand %p1175_p3, %p41_p5  ;;  %s285_s10 = int_to_ptr.vmem [resolvable:$true] %s284_s10 }
  0x22   : > { %s273_s14 = scalar_lea.sflag [#allocation3], %s272_s21  ;;  %s1314_s16 = sshra.s32 %s283_s29, 4  ;;  %s1315_s16 = int_to_ptr.hbm [resolvable:$true] %s1314_s16 }
  0x23   : > { %s1316_s1 = scalar_lea.hbm %s1315_s16, 128  ;;  %p1318_p10 = pneg %p1563_p9 }
  0x24   : > { %p1317_p2 = scmp.ne.s32.totalorder %s1315_s16, %s1316_s1  ;;  %s1321_s23 = scalar_lea.hbm %s1715_s0, 256 }
  0x25   : > { %p1322_p0 = scmp.lt.s32.totalorder %s1315_s16, %s1715_s0  ;;  %p1323_p3 = scmp.lt.s32.totalorder %s1321_s23, %s1316_s1 }
  0x26   : > { %p1319_p12 = pnand %p1318_p10, %p1317_p2 }
  0x27   : > { %p1324_p5 = por %p1323_p3, %p1322_p0 }
  0x28   : > { %p1320_p13 = pneg %p1319_p12 }
  0x2a   : > { %p1325_p11 = pnand %p1324_p5, %p1320_p13 }
  0x2c   : > { %1328 = shalt.err (!%p1325_p11)
}
  0x2d   : > { %s1425_s21 = smov 128   ;;  %s1426_s9 = smov 8  }
  0x2e   : > { %1167 = dma.hbm_to_vmem [thread:$0]  (!%p1563_p9), %s283_s29, 2048, %s285_s10, %s273_s14, %s1425_s21, %s1425_s21, %s1426_s9  }
  0x2f   : > { %296 = sbr.rel (%p1512_p8) target bundleno = 597 (0x255), region = 48  ;;  %s1580_s22 = sand.u32 (!%p1512_p8), 1, %s1410_s25  }
  0x30   : > { %s982_s16 = sshll.u32 (!%p1512_p8), %s1580_s22, 7  ;;  %s299_s1 = scalar_lea.sflag (!%p1512_p8), [#allocation3], %s1580_s22 }
  0x31   : > { %s1586_s15 = scalar_lea.vmem (!%p1512_p8), [#allocation2], %s982_s16 }
  0x34   : > { %1389 = dma.done.wait (%p1499_p4), %s299_s1, 2048  }
  0x35   : > { %1391 = vsyncadd (%p1499_p4), %s299_s1, 4294965248 }
  0x36   : > { %1393 = dma.done.wait (%p46_p1), [#allocation6], 2048  }
  0x37   : > { %1395 = vsyncadd (%p46_p1), [#allocation6], 4294965248 }
  0x38   : > { %1397 = dma.done.wait (%p46_p1), [#allocation9], 1024  }
  0x39   : > { %1399 = vsyncadd (%p46_p1), [#allocation9], 4294966272  ;;  %v1096_v0 = vld [vmem:[#allocation5 + $0x38] sm:$0xff]  ;;  %v1095_v1 = vld [vmem:[#allocation5 + $0x30] sm:$0xff]  ;;  %s1663_s23 = scalar_lea.vmem [#allocation10], %s982_s16  ;;  %s1113_s19 = sshll.u32 %s1490_s28, 7 }
  0x3a   : > { %443 = vmatpush.bf16.msra.mxu0 %v1096_v0  ;;  %1114 = vmatpush.bf16.msra.mxu3 %v1096_v0  ;;  %v1094_v2 = vld [vmem:[#allocation5 + $0x28] sm:$0xff]  ;;  %v1093_v3 = vld [vmem:[#allocation5 + $0x20] sm:$0xff]  ;;  %v1092_v4 = vld [vmem:[#allocation5 + $0x18] sm:$0xff]  ;;  %s866_s9 = scalar_lea.hbm %s1722_s7, %s1113_s19  ;;  %s867_s16 = sshll.u32 %s1663_s23, 4  ;;  %s868_s16 = int_to_ptr.vmem [resolvable:$true] %s867_s16 }
  0x3b   : > { %v1091_v5 = vld [vmem:[#allocation5 + $0x10] sm:$0xff]  ;;  %v1090_v6 = vld [vmem:[#allocation5 + $0x8] sm:$0xff]  ;;  %v1089_v7 = vld [vmem:[#allocation5] sm:$0xff]  ;;  %s869_s1 = sshll.u32 %s866_s9, 4  ;;  %s1364_s10 = scalar_lea.hbm %s1722_s7, 256  ;;  %s870_s1 = int_to_ptr.hbm [resolvable:$true] %s869_s1 }
  0x3c   : > { %v351_v8 = vld [vmem:[%s1586_s15] sm:$0xff]  ;;  %v352_v9 = vld [vmem:[%s1586_s15 + $0x8] sm:$0xff]  ;;  %v353_v14 = vld [vmem:[%s1586_s15 + $0x10] sm:$0xff]  ;;  %s1358_s30 = sshra.s32 %s870_s1, 4  ;;  %s1359_s30 = int_to_ptr.hbm [resolvable:$true] %s1358_s30 }
  0x3d   : > { %v363_v10 = vld [vmem:[%s1586_s15 + $0x60] sm:$0xff]  ;;  %v364_v11 = vld [vmem:[%s1586_s15 + $0x68] sm:$0xff]  ;;  %v367_v12 = vpack.c.bf16 %v352_v9, %v351_v8  ;;  %v354_v15 = vld [vmem:[%s1586_s15 + $0x18] sm:$0xff]  ;;  %s1360_s12 = scalar_lea.hbm %s1359_s30, 128  ;;  %p1365_p11 = scmp.lt.s32.totalorder %s1359_s30, %s1722_s7 }
  0x3e   : > { %444 = vmatpush.bf16.msra.mxu0 %v1095_v1  ;;  %1115 = vmatpush.bf16.msra.mxu3 %v1095_v1  ;;  %v373_v13 = vpack.c.bf16 %v364_v11, %v363_v10  ;;  %v365_v16 = vld [vmem:[%s1586_s15 + $0x70] sm:$0xff]  ;;  %v366_v17 = vld [vmem:[%s1586_s15 + $0x78] sm:$0xff]  ;;  %v368_v18 = vpack.c.bf16 %v354_v15, %v353_v14  ;;  %v355_v20 = vld [vmem:[%s1586_s15 + $0x20] sm:$0xff]  ;;  %p1361_p1 = scmp.ne.s32.totalorder %s1359_s30, %s1360_s12  ;;  %p1366_p9 = scmp.lt.s32.totalorder %s1364_s10, %s1360_s12 }
  0x3f   : > { %v374_v19 = vpack.c.bf16 %v366_v17, %v365_v16  ;;  %v356_v21 = vld [vmem:[%s1586_s15 + $0x28] sm:$0xff]  ;;  %v357_v23 = vld [vmem:[%s1586_s15 + $0x30] sm:$0xff]  ;;  %v358_v24 = vld [vmem:[%s1586_s15 + $0x38] sm:$0xff] }
  0x40   : > { %v369_v22 = vpack.c.bf16 %v356_v21, %v355_v20  ;;  %v370_v25 = vpack.c.bf16 %v358_v24, %v357_v23  ;;  %v1104_v26 = vld [vmem:[#allocation7 + $0x38] sm:$0xff]  ;;  %v1103_v27 = vld [vmem:[#allocation7 + $0x30] sm:$0xff]  ;;  %v1102_v28 = vld [vmem:[#allocation7 + $0x28] sm:$0xff]  ;;  %p1362_p4 = pnand %p1361_p1, %p1552_p7  ;;  %p1367_p2 = por %p1366_p9, %p1365_p11 }
  0x41   : > { %616 = vmatpush.bf16.msra.mxu1 %v1104_v26  ;;  %v359_v29 = vld [vmem:[%s1586_s15 + $0x40] sm:$0xff]  ;;  %v360_v30 = vld [vmem:[%s1586_s15 + $0x48] sm:$0xff]  ;;  %v361_v33 = vld [vmem:[%s1586_s15 + $0x50] sm:$0xff] }
  0x42   : > { %445 = vmatpush.bf16.msra.mxu0 %v1094_v2  ;;  %1116 = vmatpush.bf16.msra.mxu3 %v1094_v2  ;;  %v1101_v31 = vld [vmem:[#allocation7 + $0x20] sm:$0xff]  ;;  %v371_v32 = vpack.c.bf16 %v360_v30, %v359_v29  ;;  %v362_v34 = vld [vmem:[%s1586_s15 + $0x58] sm:$0xff]  ;;  %v1099_v37 = vld [vmem:[#allocation7 + $0x10] sm:$0xff]  ;;  %s855_s15 = scalar_lea.sflag [#allocation4], %s1580_s22  ;;  %p1363_p8 = pneg %p1362_p4 }
  0x43   : > { %v372_v35 = vpack.c.bf16 %v362_v34, %v361_v33  ;;  %v1100_v36 = vld [vmem:[#allocation7 + $0x18] sm:$0xff]  ;;  %v1098_v38 = vld [vmem:[#allocation7 + $0x8] sm:$0xff]  ;;  %v1097_v39 = vld [vmem:[#allocation7] sm:$0xff] }
  0x44   : > { %v1619_v41 = vld [vmem:[%s1717_s2] ss:$0 sm:$0xff]  ;;  %v1111_v33 = vld [vmem:[#allocation8 + $0x30] sm:$0xff]  ;;  %p1368_p10 = pnand %p1367_p2, %p1363_p8 }
  0x45   : > { %617 = vmatpush.bf16.msra.mxu1 %v1103_v27 }
  0x46   : > { %446 = vmatpush.bf16.msra.mxu0 %v1093_v3  ;;  %1117 = vmatpush.bf16.msra.mxu3 %v1093_v3 }
  0x49   : > { %618 = vmatpush.bf16.msra.mxu1 %v1102_v28 }
  0x4a   : > { %447 = vmatpush.bf16.msra.mxu0 %v1092_v4  ;;  %1118 = vmatpush.bf16.msra.mxu3 %v1092_v4 }
  0x4d   : > { %619 = vmatpush.bf16.msra.mxu1 %v1101_v31 }
  0x4e   : > { %448 = vmatpush.bf16.msra.mxu0 %v1091_v5  ;;  %1119 = vmatpush.bf16.msra.mxu3 %v1091_v5 }
  0x51   : > { %620 = vmatpush.bf16.msra.mxu1 %v1100_v36 }
  0x52   : > { %449 = vmatpush.bf16.msra.mxu0 %v1090_v6  ;;  %1120 = vmatpush.bf16.msra.mxu3 %v1090_v6 }
  0x55   : > { %621 = vmatpush.bf16.msra.mxu1 %v1099_v37 }
  0x56   : > { %450 = vmatpush.bf16.msra.mxu0 %v1089_v7  ;;  %1121 = vmatpush.bf16.msra.mxu3 %v1089_v7 }
  0x59   : > { %451 = vmatmul.bf16.vlgmr.msra.gmra.mxu0 %v367_v12  ;;  %481 = vmatmul.bf16.vlgmr.msra.gmra.mxu3 %v373_v13 }
  0x5a   : > { %1122 = vmatpush.bf16.msrb.mxu3 %v1104_v26  ;;  %622 = vmatpush.bf16.msra.mxu1 %v1098_v38 }
  0x5e   : > { %1123 = vmatpush.bf16.msrb.mxu3 %v1103_v27  ;;  %623 = vmatpush.bf16.msra.mxu1 %v1097_v39 }
  0x62   : > { %1124 = vmatpush.bf16.msrb.mxu3 %v1102_v28 }
  0x66   : > { %1125 = vmatpush.bf16.msrb.mxu3 %v1101_v31 }
  0x69   : > { %456 = vmatmul.bf16.gmra.mxu0 %v368_v18  ;;  %486 = vmatmul.bf16.gmra.mxu3 %v374_v19 }
  0x6a   : > { %1126 = vmatpush.bf16.msrb.mxu3 %v1100_v36 }
  0x6e   : > { %1127 = vmatpush.bf16.msrb.mxu3 %v1099_v37 }
  0x72   : > { %1128 = vmatpush.bf16.msrb.mxu3 %v1098_v38 }
  0x76   : > { %1129 = vmatpush.bf16.msrb.mxu3 %v1097_v39  ;;  %v1109_v39 = vld [vmem:[#allocation8 + $0x20] sm:$0xff] }
  0x79   : > { %461 = vmatmul.bf16.gmra.mxu0 %v369_v22 }
  0x89   : > { %466 = vmatmul.bf16.gmra.mxu0 %v370_v25 }
  0x99   : > { %471 = vmatmul.bf16.gmra.mxu0 %v371_v32  ;;  %v1112_v32 = vld [vmem:[#allocation8 + $0x38] sm:$0xff] }
  0x9a   : > { %789 = vmatpush.bf16.msra.mxu2 %v1112_v32  ;;  %1130 = vmatpush.bf16.msra.mxu3 %v1112_v32 }
  0x9e   : > { %790 = vmatpush.bf16.msra.mxu2 %v1111_v33  ;;  %1131 = vmatpush.bf16.msra.mxu3 %v1111_v33 }
  0xa9   : > { %476 = vmatmul.bf16.gmra.mxu0 %v372_v35  ;;  %v1110_v35 = vld [vmem:[#allocation8 + $0x28] sm:$0xff] }
  0xaa   : > { %791 = vmatpush.bf16.msra.mxu2 %v1110_v35  ;;  %1132 = vmatpush.bf16.msra.mxu3 %v1110_v35 }
  0xae   : > { %792 = vmatpush.bf16.msra.mxu2 %v1109_v39  ;;  %1133 = vmatpush.bf16.msra.mxu3 %v1109_v39 }
  0xd6   : > { %v452_v40 = vpop.f32.mrf.mxu0 }
  0xd7   : > { %v453_v42 = vadd.f32 %v1619_v41, %v452_v40 }
  0xd9   : > { %v508_v45 = vmul.f32 0.01, %v453_v42  ;;  %vm492_vm0 = vcmp.gt.f32.partialorder %v453_v42, 0.0 }
  0xdb   : > { %v524_v49 = vsel %vm492_vm0, %v453_v42, %v508_v45 }
  0xdc   : > { %v482_v43 = vpop.f32.mrf.mxu3 }
  0xdd   : > { %v483_v47 = vadd.f32 %v1619_v41, %v482_v43 }
  0xde   : > { %v454_v44 = vpop.f32.mrf.mxu0 }
  0xdf   : > { %v455_v46 = vadd.f32 %v1619_v41, %v454_v44  ;;  %v520_v51 = vmul.f32 0.01, %v483_v47  ;;  %vm504_vm2 = vcmp.gt.f32.partialorder %v483_v47, 0.0 }
  0xe1   : > { %v509_v48 = vmul.f32 0.01, %v455_v46  ;;  %vm493_vm1 = vcmp.gt.f32.partialorder %v455_v46, 0.0  ;;  %v536_v57 = vsel %vm504_vm2, %v483_v47, %v520_v51 }
  0xe3   : > { %v525_v50 = vsel %vm493_vm1, %v455_v46, %v509_v48 }
  0xe4   : > { %v540_v52 = vpack.c.bf16 %v525_v50, %v524_v49  ;;  %v484_v53 = vpop.f32.mrf.mxu3 }
  0xe5   : > { %v485_v54 = vadd.f32 %v1619_v41, %v484_v53 }
  0xe6   : > { %v457_v55 = vpop.f32.mrf.mxu0  ;;  %624 = vmatmul.bf16.vlgmr.msra.gmra.mxu1 %v540_v52 }
  0xe7   : > { %vm505_vm3 = vcmp.gt.f32.partialorder %v485_v54, 0.0  ;;  %v521_v56 = vmul.f32 0.01, %v485_v54  ;;  %v458_v60 = vadd.f32 %v1619_v41, %v457_v55  ;;  %v1107_v55 = vld [vmem:[#allocation8 + $0x10] sm:$0xff] }
  0xe9   : > { %v537_v58 = vsel %vm505_vm3, %v485_v54, %v521_v56  ;;  %v510_v63 = vmul.f32 0.01, %v458_v60  ;;  %vm494_vm4 = vcmp.gt.f32.partialorder %v458_v60, 0.0  ;;  %v1108_v54 = vld [vmem:[#allocation8 + $0x18] sm:$0xff]  ;;  %v1106_v56 = vld [vmem:[#allocation8 + $0x8] sm:$0xff] }
  0xea   : > { %v546_v59 = vpack.c.bf16 %v537_v58, %v536_v57  ;;  %793 = vmatpush.bf16.msra.mxu2 %v1108_v54  ;;  %1134 = vmatpush.bf16.msra.mxu3 %v1108_v54  ;;  %v1105_v57 = vld [vmem:[#allocation8] sm:$0xff] }
  0xeb   : > { %v526_v3 = vsel %vm494_vm4, %v458_v60, %v510_v63  ;;  %v1640_v58 = vld [vmem:[%s1719_s4] ss:$0 sm:$0xff] }
  0xec   : > { %v487_v61 = vpop.f32.mrf.mxu3  ;;  %654 = vmatmul.bf16.vlgmr.msrb.gmra.mxu3 %v546_v59 }
  0xed   : > { %v488_v1 = vadd.f32 %v1619_v41, %v487_v61 }
  0xee   : > { %v459_v62 = vpop.f32.mrf.mxu0  ;;  %794 = vmatpush.bf16.msra.mxu2 %v1107_v55  ;;  %1135 = vmatpush.bf16.msra.mxu3 %v1107_v55 }
  0xef   : > { %v460_v0 = vadd.f32 %v1619_v41, %v459_v62  ;;  %v522_v5 = vmul.f32 0.01, %v488_v1  ;;  %vm506_vm6 = vcmp.gt.f32.partialorder %v488_v1, 0.0 }
  0xf1   : > { %v511_v2 = vmul.f32 0.01, %v460_v0  ;;  %vm495_vm5 = vcmp.gt.f32.partialorder %v460_v0, 0.0  ;;  %v538_v11 = vsel %vm506_vm6, %v488_v1, %v522_v5 }
  0xf2   : > { %795 = vmatpush.bf16.msra.mxu2 %v1106_v56  ;;  %1136 = vmatpush.bf16.msra.mxu3 %v1106_v56 }
  0xf3   : > { %v527_v4 = vsel %vm495_vm5, %v460_v0, %v511_v2 }
  0xf4   : > { %v541_v6 = vpack.c.bf16 %v527_v4, %v526_v3  ;;  %v489_v7 = vpop.f32.mrf.mxu3 }
  0xf5   : > { %v490_v8 = vadd.f32 %v1619_v41, %v489_v7 }
  0xf6   : > { %v462_v9 = vpop.f32.mrf.mxu0  ;;  %629 = vmatmul.bf16.gmra.mxu1 %v541_v6  ;;  %796 = vmatpush.bf16.msra.mxu2 %v1105_v57 }
  0xf7   : > { %v523_v10 = vmul.f32 0.01, %v490_v8  ;;  %vm507_vm7 = vcmp.gt.f32.partialorder %v490_v8, 0.0  ;;  %v463_v14 = vadd.f32 %v1619_v41, %v462_v9  ;;  %1137 = vmatpush.bf16.msra.mxu3 %v1105_v57 }
  0xf9   : > { %v539_v12 = vsel %vm507_vm7, %v490_v8, %v523_v10  ;;  %v512_v16 = vmul.f32 0.01, %v463_v14  ;;  %vm496_vm8 = vcmp.gt.f32.partialorder %v463_v14, 0.0 }
  0xfa   : > { %v547_v13 = vpack.c.bf16 %v539_v12, %v538_v11 }
  0xfb   : > { %v528_v19 = vsel %vm496_vm8, %v463_v14, %v512_v16 }
  0xfc   : > { %659 = vmatmul.bf16.gmra.mxu3 %v547_v13 }
  0xfe   : > { %v464_v15 = vpop.f32.mrf.mxu0 }
  0xff   : > { %v465_v17 = vadd.f32 %v1619_v41, %v464_v15 }
 0x101   : > { %v513_v18 = vmul.f32 0.01, %v465_v17  ;;  %vm497_vm9 = vcmp.gt.f32.partialorder %v465_v17, 0.0 }
 0x103   : > { %v529_v20 = vsel %vm497_vm9, %v465_v17, %v513_v18 }
 0x104   : > { %v542_v21 = vpack.c.bf16 %v529_v20, %v528_v19 }
 0x106   : > { %v467_v22 = vpop.f32.mrf.mxu0  ;;  %634 = vmatmul.bf16.gmra.mxu1 %v542_v21 }
 0x107   : > { %v468_v23 = vadd.f32 %v1619_v41, %v467_v22 }
 0x109   : > { %v514_v25 = vmul.f32 0.01, %v468_v23  ;;  %vm498_vm10 = vcmp.gt.f32.partialorder %v468_v23, 0.0 }
 0x10b   : > { %v530_v28 = vsel %vm498_vm10, %v468_v23, %v514_v25 }
 0x10e   : > { %v469_v24 = vpop.f32.mrf.mxu0 }
 0x10f   : > { %v470_v26 = vadd.f32 %v1619_v41, %v469_v24 }
 0x111   : > { %v515_v27 = vmul.f32 0.01, %v470_v26  ;;  %vm499_vm11 = vcmp.gt.f32.partialorder %v470_v26, 0.0 }
 0x113   : > { %v531_v29 = vsel %vm499_vm11, %v470_v26, %v515_v27 }
 0x114   : > { %v543_v30 = vpack.c.bf16 %v531_v29, %v530_v28 }
 0x116   : > { %v472_v31 = vpop.f32.mrf.mxu0  ;;  %639 = vmatmul.bf16.gmra.mxu1 %v543_v30 }
 0x117   : > { %v473_v34 = vadd.f32 %v1619_v41, %v472_v31 }
 0x119   : > { %v516_v37 = vmul.f32 0.01, %v473_v34  ;;  %vm500_vm12 = vcmp.gt.f32.partialorder %v473_v34, 0.0 }
 0x11b   : > { %v532_v42 = vsel %vm500_vm12, %v473_v34, %v516_v37 }
 0x11e   : > { %v474_v36 = vpop.f32.mrf.mxu0 }
 0x11f   : > { %v475_v38 = vadd.f32 %v1619_v41, %v474_v36 }
 0x121   : > { %v517_v40 = vmul.f32 0.01, %v475_v38  ;;  %vm501_vm13 = vcmp.gt.f32.partialorder %v475_v38, 0.0 }
 0x123   : > { %v533_v43 = vsel %vm501_vm13, %v475_v38, %v517_v40 }
 0x124   : > { %v544_v44 = vpack.c.bf16 %v533_v43, %v532_v42 }
 0x126   : > { %v477_v45 = vpop.f32.mrf.mxu0  ;;  %644 = vmatmul.bf16.gmra.mxu1 %v544_v44 }
 0x127   : > { %v478_v46 = vadd.f32 %v1619_v41, %v477_v45 }
 0x129   : > { %v518_v48 = vmul.f32 0.01, %v478_v46  ;;  %vm502_vm14 = vcmp.gt.f32.partialorder %v478_v46, 0.0 }
 0x12b   : > { %v534_v51 = vsel %vm502_vm14, %v478_v46, %v518_v48 }
 0x12e   : > { %v479_v47 = vpop.f32.mrf.mxu0 }
 0x12f   : > { %v480_v49 = vadd.f32 %v1619_v41, %v479_v47 }
 0x131   : > { %v519_v50 = vmul.f32 0.01, %v480_v49  ;;  %vm503_vm15 = vcmp.gt.f32.partialorder %v480_v49, 0.0 }
 0x133   : > { %v535_v52 = vsel %vm503_vm15, %v480_v49, %v519_v50 }
 0x134   : > { %v545_v53 = vpack.c.bf16 %v535_v52, %v534_v51 }
 0x136   : > { %649 = vmatmul.bf16.gmra.mxu1 %v545_v53 }
 0x163   : > { %v625_v41 = vpop.f32.mrf.mxu1 }
 0x164   : > { %v626_v59 = vadd.f32 %v1640_v58, %v625_v41 }
 0x166   : > { %v681_v61 = vmul.f32 0.01, %v626_v59  ;;  %vm665_vm0 = vcmp.gt.f32.partialorder %v626_v59, 0.0 }
 0x168   : > { %v697_v1 = vsel %vm665_vm0, %v626_v59, %v681_v61 }
 0x16b   : > { %v627_v60 = vpop.f32.mrf.mxu1 }
 0x16c   : > { %v628_v62 = vadd.f32 %v1640_v58, %v627_v60 }
 0x16e   : > { %v682_v63 = vmul.f32 0.01, %v628_v62  ;;  %vm666_vm1 = vcmp.gt.f32.partialorder %v628_v62, 0.0 }
 0x16f   : > { %v655_v0 = vpop.f32.mrf.mxu3 }
 0x170   : > { %v698_v2 = vsel %vm666_vm1, %v628_v62, %v682_v63  ;;  %v656_v4 = vadd.f32 %v1640_v58, %v655_v0 }
 0x171   : > { %v713_v3 = vpack.c.bf16 %v698_v2, %v697_v1 }
 0x172   : > { %v693_v6 = vmul.f32 0.01, %v656_v4  ;;  %vm677_vm2 = vcmp.gt.f32.partialorder %v656_v4, 0.0 }
 0x173   : > { %v630_v5 = vpop.f32.mrf.mxu1  ;;  %797 = vmatmul.bf16.vlgmr.msra.gmra.mxu2 %v713_v3  ;;  %v1223_v3 = vld [vmem:[%s1721_s6] ss:$0 sm:$0xff] }
 0x174   : > { %v631_v8 = vadd.f32 %v1640_v58, %v630_v5  ;;  %v709_v10 = vsel %vm677_vm2, %v656_v4, %v693_v6 }
 0x176   : > { %v683_v13 = vmul.f32 0.01, %v631_v8  ;;  %vm667_vm4 = vcmp.gt.f32.partialorder %v631_v8, 0.0 }
 0x177   : > { %v657_v7 = vpop.f32.mrf.mxu3 }
 0x178   : > { %v658_v9 = vadd.f32 %v1640_v58, %v657_v7  ;;  %v699_v19 = vsel %vm667_vm4, %v631_v8, %v683_v13 }
 0x17a   : > { %vm678_vm3 = vcmp.gt.f32.partialorder %v658_v9, 0.0  ;;  %v694_v11 = vmul.f32 0.01, %v658_v9 }
 0x17b   : > { %v632_v12 = vpop.f32.mrf.mxu1 }
 0x17c   : > { %v633_v14 = vadd.f32 %v1640_v58, %v632_v12  ;;  %v710_v15 = vsel %vm678_vm3, %v658_v9, %v694_v11 }
 0x17d   : > { %v719_v16 = vpack.c.bf16 %v710_v15, %v709_v10 }
 0x17e   : > { %v684_v17 = vmul.f32 0.01, %v633_v14  ;;  %vm668_vm5 = vcmp.gt.f32.partialorder %v633_v14, 0.0 }
 0x17f   : > { %v660_v18 = vpop.f32.mrf.mxu3  ;;  %827 = vmatmul.bf16.vlgmr.msra.gmra.mxu3 %v719_v16 }
 0x180   : > { %v700_v20 = vsel %vm668_vm5, %v633_v14, %v684_v17  ;;  %v661_v22 = vadd.f32 %v1640_v58, %v660_v18 }
 0x181   : > { %v714_v21 = vpack.c.bf16 %v700_v20, %v699_v19 }
 0x182   : > { %v695_v24 = vmul.f32 0.01, %v661_v22  ;;  %vm679_vm6 = vcmp.gt.f32.partialorder %v661_v22, 0.0 }
 0x183   : > { %v635_v23 = vpop.f32.mrf.mxu1  ;;  %802 = vmatmul.bf16.gmra.mxu2 %v714_v21 }
 0x184   : > { %v636_v26 = vadd.f32 %v1640_v58, %v635_v23  ;;  %v711_v29 = vsel %vm679_vm6, %v661_v22, %v695_v24 }
 0x186   : > { %v685_v31 = vmul.f32 0.01, %v636_v26  ;;  %vm669_vm8 = vcmp.gt.f32.partialorder %v636_v26, 0.0 }
 0x187   : > { %v662_v25 = vpop.f32.mrf.mxu3 }
 0x188   : > { %v663_v27 = vadd.f32 %v1640_v58, %v662_v25  ;;  %v701_v36 = vsel %vm669_vm8, %v636_v26, %v685_v31 }
 0x18a   : > { %v696_v28 = vmul.f32 0.01, %v663_v27  ;;  %vm680_vm7 = vcmp.gt.f32.partialorder %v663_v27, 0.0 }
 0x18b   : > { %v637_v30 = vpop.f32.mrf.mxu1 }
 0x18c   : > { %v638_v32 = vadd.f32 %v1640_v58, %v637_v30  ;;  %v712_v33 = vsel %vm680_vm7, %v663_v27, %v696_v28 }
 0x18d   : > { %v720_v34 = vpack.c.bf16 %v712_v33, %v711_v29 }
 0x18e   : > { %v686_v35 = vmul.f32 0.01, %v638_v32  ;;  %vm670_vm9 = vcmp.gt.f32.partialorder %v638_v32, 0.0 }
 0x18f   : > { %832 = vmatmul.bf16.gmra.mxu3 %v720_v34 }
 0x190   : > { %v702_v37 = vsel %vm670_vm9, %v638_v32, %v686_v35 }
 0x191   : > { %v715_v38 = vpack.c.bf16 %v702_v37, %v701_v36 }
 0x193   : > { %v640_v39 = vpop.f32.mrf.mxu1  ;;  %807 = vmatmul.bf16.gmra.mxu2 %v715_v38 }
 0x194   : > { %v641_v40 = vadd.f32 %v1640_v58, %v640_v39 }
 0x196   : > { %v687_v43 = vmul.f32 0.01, %v641_v40  ;;  %vm671_vm10 = vcmp.gt.f32.partialorder %v641_v40, 0.0 }
 0x198   : > { %v703_v46 = vsel %vm671_vm10, %v641_v40, %v687_v43 }
 0x19b   : > { %v642_v42 = vpop.f32.mrf.mxu1 }
 0x19c   : > { %v643_v44 = vadd.f32 %v1640_v58, %v642_v42 }
 0x19e   : > { %v688_v45 = vmul.f32 0.01, %v643_v44  ;;  %vm672_vm11 = vcmp.gt.f32.partialorder %v643_v44, 0.0 }
 0x1a0   : > { %v704_v47 = vsel %vm672_vm11, %v643_v44, %v688_v45 }
 0x1a1   : > { %v716_v48 = vpack.c.bf16 %v704_v47, %v703_v46 }
 0x1a3   : > { %v645_v49 = vpop.f32.mrf.mxu1  ;;  %812 = vmatmul.bf16.gmra.mxu2 %v716_v48 }
 0x1a4   : > { %v646_v50 = vadd.f32 %v1640_v58, %v645_v49 }
 0x1a6   : > { %v689_v52 = vmul.f32 0.01, %v646_v50  ;;  %vm673_vm12 = vcmp.gt.f32.partialorder %v646_v50, 0.0 }
 0x1a8   : > { %v705_v55 = vsel %vm673_vm12, %v646_v50, %v689_v52 }
 0x1ab   : > { %v647_v51 = vpop.f32.mrf.mxu1 }
 0x1ac   : > { %v648_v53 = vadd.f32 %v1640_v58, %v647_v51 }
 0x1ae   : > { %v690_v54 = vmul.f32 0.01, %v648_v53  ;;  %vm674_vm13 = vcmp.gt.f32.partialorder %v648_v53, 0.0 }
 0x1b0   : > { %v706_v56 = vsel %vm674_vm13, %v648_v53, %v690_v54 }
 0x1b1   : > { %v717_v57 = vpack.c.bf16 %v706_v56, %v705_v55 }
 0x1b3   : > { %v650_v41 = vpop.f32.mrf.mxu1  ;;  %817 = vmatmul.bf16.gmra.mxu2 %v717_v57 }
 0x1b4   : > { %v651_v59 = vadd.f32 %v1640_v58, %v650_v41 }
 0x1b6   : > { %v691_v61 = vmul.f32 0.01, %v651_v59  ;;  %vm675_vm14 = vcmp.gt.f32.partialorder %v651_v59, 0.0 }
 0x1b8   : > { %v707_v0 = vsel %vm675_vm14, %v651_v59, %v691_v61 }
 0x1bb   : > { %v652_v60 = vpop.f32.mrf.mxu1 }
 0x1bc   : > { %v653_v62 = vadd.f32 %v1640_v58, %v652_v60 }
 0x1be   : > { %v692_v63 = vmul.f32 0.01, %v653_v62  ;;  %vm676_vm15 = vcmp.gt.f32.partialorder %v653_v62, 0.0 }
 0x1c0   : > { %v708_v1 = vsel %vm676_vm15, %v653_v62, %v692_v63 }
 0x1c1   : > { %v718_v2 = vpack.c.bf16 %v708_v1, %v707_v0 }
 0x1c3   : > { %822 = vmatmul.bf16.gmra.mxu2 %v718_v2 }
 0x1f6   : > { %v798_v4 = vpop.f32.mrf.mxu2 }
 0x1f7   : > { %v799_v5 = vadd.f32 %v1223_v3, %v798_v4 }
 0x1f9   : > { %838 = vst [vmem:[%s1663_s23] sm:$0xff] %v799_v5 }
 0x1fe   : > { %v800_v58 = vpop.f32.mrf.mxu2 }
 0x1ff   : > { %v801_v6 = vadd.f32 %v1223_v3, %v800_v58 }
 0x201   : > { %839 = vst [vmem:[%s1663_s23 + $0x8] sm:$0xff] %v801_v6 }
 0x202   : > { %v828_v7 = vpop.f32.mrf.mxu3 }
 0x203   : > { %v829_v8 = vadd.f32 %v1223_v3, %v828_v7 }
 0x205   : > { %850 = vst [vmem:[%s1663_s23 + $0x60] sm:$0xff] %v829_v8 }
 0x206   : > { %v803_v9 = vpop.f32.mrf.mxu2 }
 0x207   : > { %v804_v10 = vadd.f32 %v1223_v3, %v803_v9 }
 0x209   : > { %840 = vst [vmem:[%s1663_s23 + $0x10] sm:$0xff] %v804_v10 }
 0x20a   : > { %v830_v11 = vpop.f32.mrf.mxu3 }
 0x20b   : > { %v831_v12 = vadd.f32 %v1223_v3, %v830_v11 }
 0x20d   : > { %851 = vst [vmem:[%s1663_s23 + $0x68] sm:$0xff] %v831_v12 }
 0x20e   : > { %v805_v13 = vpop.f32.mrf.mxu2 }
 0x20f   : > { %v806_v14 = vadd.f32 %v1223_v3, %v805_v13 }
 0x211   : > { %841 = vst [vmem:[%s1663_s23 + $0x18] sm:$0xff] %v806_v14 }
 0x212   : > { %v833_v15 = vpop.f32.mrf.mxu3 }
 0x213   : > { %v834_v16 = vadd.f32 %v1223_v3, %v833_v15 }
 0x215   : > { %852 = vst [vmem:[%s1663_s23 + $0x70] sm:$0xff] %v834_v16 }
 0x216   : > { %v808_v17 = vpop.f32.mrf.mxu2 }
 0x217   : > { %v809_v18 = vadd.f32 %v1223_v3, %v808_v17 }
 0x219   : > { %842 = vst [vmem:[%s1663_s23 + $0x20] sm:$0xff] %v809_v18 }
 0x21a   : > { %v835_v19 = vpop.f32.mrf.mxu3 }
 0x21b   : > { %v836_v20 = vadd.f32 %v1223_v3, %v835_v19 }
 0x21d   : > { %853 = vst [vmem:[%s1663_s23 + $0x78] sm:$0xff] %v836_v20 }
 0x21e   : > { %v810_v21 = vpop.f32.mrf.mxu2 }
 0x21f   : > { %v811_v22 = vadd.f32 %v1223_v3, %v810_v21 }
 0x221   : > { %843 = vst [vmem:[%s1663_s23 + $0x28] sm:$0xff] %v811_v22 }
 0x226   : > { %v813_v23 = vpop.f32.mrf.mxu2 }
 0x227   : > { %v814_v24 = vadd.f32 %v1223_v3, %v813_v23 }
 0x229   : > { %844 = vst [vmem:[%s1663_s23 + $0x30] sm:$0xff] %v814_v24 }
 0x22e   : > { %v815_v25 = vpop.f32.mrf.mxu2 }
 0x22f   : > { %v816_v26 = vadd.f32 %v1223_v3, %v815_v25 }
 0x231   : > { %845 = vst [vmem:[%s1663_s23 + $0x38] sm:$0xff] %v816_v26 }
 0x236   : > { %v818_v27 = vpop.f32.mrf.mxu2 }
 0x237   : > { %v819_v28 = vadd.f32 %v1223_v3, %v818_v27 }
 0x239   : > { %846 = vst [vmem:[%s1663_s23 + $0x40] sm:$0xff] %v819_v28 }
 0x23e   : > { %v820_v29 = vpop.f32.mrf.mxu2 }
 0x23f   : > { %v821_v30 = vadd.f32 %v1223_v3, %v820_v29 }
 0x241   : > { %847 = vst [vmem:[%s1663_s23 + $0x48] sm:$0xff] %v821_v30 }
 0x246   : > { %v823_v31 = vpop.f32.mrf.mxu2 }
 0x247   : > { %v824_v32 = vadd.f32 %v1223_v3, %v823_v31 }
 0x249   : > { %848 = vst [vmem:[%s1663_s23 + $0x50] sm:$0xff] %v824_v32 }
 0x24e   : > { %v825_v33 = vpop.f32.mrf.mxu2 }
 0x24f   : > { %v826_v34 = vadd.f32 %v1223_v3, %v825_v33 }
 0x251   : > { %849 = vst [vmem:[%s1663_s23 + $0x58] sm:$0xff] %v826_v34 }
 0x252   : > { %1371 = shalt.err (!%p1368_p10)
}
 0x253   : > { %s1427_s22 = smov 128   ;;  %s1428_s23 = smov 8  }
 0x254   : > { %1152 = dma.vmem_to_hbm [thread:$0]  (%p1552_p7), %s868_s16, 2048, %s870_s1, %s855_s15, %s1427_s22, %s1427_s22, %s1428_s23  }
 0x255 PF: > { %s884_s19 = sand.u32 1, %s1406_s24   ;;  %p1731_p12 = scmp.ge.s32.totalorder %s1418_s27, 2 }
 0x256   : > { %s885_s20 = scalar_lea.sflag [#allocation4], %s884_s19 }
 0x257   : > { %p1169_p13 = pnand %p1731_p12, %p1504_p6 }
 0x259   : > { %p1170_p0 = pneg %p1169_p13 }
 0x25b   : > { %1401 = dma.done.wait (%p1170_p0), %s885_s20, 2048  }
 0x25c   : > { %1403 = vsyncadd (%p1170_p0), %s885_s20, 4294965248  ;;  %p22_p3 = scmp.ge.s32.totalorder %s1536_s11, 4   ;;  %s1732_s24 = smov %s1410_s25 }
 0x25d   : > { %s1733_s25 = smov %s1414_s26  ;;  %s1734_s26 = smov %s1548_s17 }
 0x25e   : > { %s1735_s27 = smov %s1536_s11  ;;  %24 = sbr.rel (!%p22_p3) target bundleno = 9 (0x9), region = 105 }
 0x263   :  { %891 = vsyncpa [#allocation3], 1 }
 0x264   :  { %893 = vsyncpa [#allocation3 + $0x1], 1 }
 0x265   :  { %894 = vsyncpa [#allocation6], 1 }
 0x266   :  { %895 = vsyncpa [#allocation9], 1 }
 0x267   :  { %896 = vsyncpa [#allocation4], 1 }
 0x268   :  { %898 = vsyncpa [#allocation4 + $0x1], 1 }

</bundles_post_ra>
